<compile_context>
chip_gen: v6e
topology: v6e:2x2x1
jax: 0.10.0
libtpu: 0.0.40
codegen_flags: <defaults>
</compile_context>

<pallas_src>
import functools

import jax
import jax.numpy as jnp
from jax.experimental import pallas as pl
from jax.experimental.pallas import tpu as pltpu

OUT_PAD = 128  # value head padded from 1 -> 128 lanes for lane-dense stores


def critic_kernel(x_ref, w1_ref, b1_ref, w2_ref, b2_ref, w3_ref, b3_ref, o_ref):
    # One (TILE_B, num_state) slab of the batch. Weights/biases use a constant
    # index_map so they are DMA'd once and stay resident across grid steps.
    x = x_ref[...].astype(jnp.bfloat16)

    # fc1 + ReLU (bf16 MXU inputs, f32 accumulation)
    h1 = jnp.dot(x, w1_ref[...], preferred_element_type=jnp.float32) + b1_ref[...]
    h1 = jnp.maximum(h1, 0.0).astype(jnp.bfloat16)

    # fc2 + ReLU
    h2 = jnp.dot(h1, w2_ref[...], preferred_element_type=jnp.float32) + b2_ref[...]
    h2 = jnp.maximum(h2, 0.0).astype(jnp.bfloat16)

    # state_value head, padded to 128 output lanes (column 0 is the real value)
    v = jnp.dot(h2, w3_ref[...], preferred_element_type=jnp.float32) + b3_ref[...]
    o_ref[...] = v.astype(o_ref.dtype)


@functools.partial(jax.jit, static_argnames=("tile_b",))
def critic_forward(x, params, *, tile_b=128):
    """x: (B, num_state) float32 -> (B, 1) float32 state values."""
    B, S = x.shape
    H = params["w1"].shape[1]

    # bf16 weights for the MXU; biases stay f32 (added to the f32 accumulator).
    w1 = params["w1"].astype(jnp.bfloat16)
    w2 = params["w2"].astype(jnp.bfloat16)
    b1 = params["b1"]
    b2 = params["b2"]
    # Pad the 1-wide value head to 128 zero-filled columns (lane-dense output).
    w3 = jnp.zeros((H, OUT_PAD), jnp.bfloat16).at[:, :1].set(
        params["w3"].astype(jnp.bfloat16))
    b3 = jnp.zeros((1, OUT_PAD), jnp.float32).at[:, :1].set(params["b3"])

    # Pad batch up to a multiple of the batch tile; padded rows are sliced off.
    n_tiles = pl.cdiv(B, tile_b)
    b_pad = n_tiles * tile_b
    if b_pad != B:
        x = jnp.pad(x, ((0, b_pad - B), (0, 0)))

    const = lambda i: (0, 0)  # same block every grid step -> no re-DMA
    flops = 2 * b_pad * (S * H + H * H + H * OUT_PAD)
    bytes_accessed = (
        b_pad * S * 4 + b_pad * OUT_PAD * 4                     # x in, out
        + (S * H + H * H + H * OUT_PAD) * 2                     # bf16 weights
        + (2 * H + OUT_PAD) * 4)                                # f32 biases

    out = pl.pallas_call(
        critic_kernel,
        out_shape=jax.ShapeDtypeStruct((b_pad, OUT_PAD), jnp.float32),
        grid=(n_tiles,),
        in_specs=[
            pl.BlockSpec((tile_b, S), lambda i: (i, 0)),   # x: streamed per tile
            pl.BlockSpec((S, H), const),                   # w1: VMEM-resident
            pl.BlockSpec((1, H), const),                   # b1
            pl.BlockSpec((H, H), const),                   # w2
            pl.BlockSpec((1, H), const),                   # b2
            pl.BlockSpec((H, OUT_PAD), const),             # w3 (padded)
            pl.BlockSpec((1, OUT_PAD), const),             # b3 (padded)
        ],
        out_specs=pl.BlockSpec((tile_b, OUT_PAD), lambda i: (i, 0)),
        compiler_params=pltpu.CompilerParams(
            dimension_semantics=("parallel",)),            # v7x: 2 TCs share grid
        cost_estimate=pl.CostEstimate(
            flops=flops, transcendentals=0, bytes_accessed=bytes_accessed),
    )(x, w1, b1, w2, b2, w3, b3)

    return out[:B, :1]


def init_critic_params(key, num_state, hidden_size=256):
    """Deterministic init mirroring nn.Linear's uniform(-1/sqrt(fan_in), +)."""
    ks = jax.random.split(key, 6)

    def linear(kw, kb, fan_in, fan_out):
        bound = 1.0 / jnp.sqrt(jnp.float32(fan_in))
        # stored as (in, out) so the kernel computes x @ W
        w = jax.random.uniform(kw, (fan_in, fan_out), jnp.float32, -bound, bound)
        b = jax.random.uniform(kb, (1, fan_out), jnp.float32, -bound, bound)
        return w, b

    w1, b1 = linear(ks[0], ks[1], num_state, hidden_size)
    w2, b2 = linear(ks[2], ks[3], hidden_size, hidden_size)
    w3, b3 = linear(ks[4], ks[5], hidden_size, 1)
    return {"w1": w1, "b1": b1, "w2": w2, "b2": b2, "w3": w3, "b3": b3}


if __name__ == "__main__":
    key = jax.random.PRNGKey(0)
    k_x, k_p = jax.random.split(key)

    # Small shapes consistent with the module: (batch, num_state) -> (batch, 1).
    batch = 200          # not a tile multiple -> exercises batch padding path
    num_state = 32
    hidden_size = 256    # matches the PyTorch default

    x = jax.random.normal(k_x, (batch, num_state), dtype=jnp.float32)
    params = init_critic_params(k_p, num_state, hidden_size)

    value = critic_forward(x, params)
    value = jax.block_until_ready(value)
    assert value.shape == (batch, 1)

    # Pure-JAX reference with the same bf16-weight / f32-accumulate dtype path.
    xb = x.astype(jnp.bfloat16)
    w1b = params["w1"].astype(jnp.bfloat16)
    w2b = params["w2"].astype(jnp.bfloat16)
    w3b = params["w3"].astype(jnp.bfloat16)
    h1 = jnp.maximum(
        jnp.dot(xb, w1b, preferred_element_type=jnp.float32) + params["b1"], 0.0)
    h2 = jnp.maximum(
        jnp.dot(h1.astype(jnp.bfloat16), w2b,
                preferred_element_type=jnp.float32) + params["b2"], 0.0)
    ref = jnp.dot(h2.astype(jnp.bfloat16), w3b,
                  preferred_element_type=jnp.float32) + params["b3"]

    assert jnp.allclose(value, ref, atol=1e-3, rtol=1e-3), float(
        jnp.max(jnp.abs(value - ref)))

    print("KERNEL_OK")
</pallas_src>

<mosaic_0001>
module attributes {stable_mosaic.version = 11 : i64} {
  func.func @critic_kernel(%arg0: i32, %arg1: memref<128x32xf32, #tpu.memory_space<vmem>>, %arg2: memref<32x256xbf16, #tpu.memory_space<vmem>>, %arg3: memref<1x256xf32, #tpu.memory_space<vmem>>, %arg4: memref<256x256xbf16, #tpu.memory_space<vmem>>, %arg5: memref<1x256xf32, #tpu.memory_space<vmem>>, %arg6: memref<256x128xbf16, #tpu.memory_space<vmem>>, %arg7: memref<1x128xf32, #tpu.memory_space<vmem>>, %arg8: memref<128x128xf32, #tpu.memory_space<vmem>>) attributes {dimension_semantics = [#tpu.dimension_semantics<parallel>], iteration_bounds = array<i64: 2>, scalar_prefetch = 0 : i64, scratch_operands = 0 : i64, tpu.core_type = #tpu.core_type<tc>, window_params = [{transform_indices = @transform_0, window_bounds = array<i64: 128, 32>}, {pipeline_mode = #tpu.pipeline_mode<synchronous>, transform_indices = @transform_1, window_bounds = array<i64: 32, 256>}, {pipeline_mode = #tpu.pipeline_mode<synchronous>, transform_indices = @transform_2, window_bounds = array<i64: 1, 256>}, {pipeline_mode = #tpu.pipeline_mode<synchronous>, transform_indices = @transform_3, window_bounds = array<i64: 256, 256>}, {pipeline_mode = #tpu.pipeline_mode<synchronous>, transform_indices = @transform_4, window_bounds = array<i64: 1, 256>}, {pipeline_mode = #tpu.pipeline_mode<synchronous>, transform_indices = @transform_5, window_bounds = array<i64: 256, 128>}, {pipeline_mode = #tpu.pipeline_mode<synchronous>, transform_indices = @transform_6, window_bounds = array<i64: 1, 128>}, {transform_indices = @transform_7, window_bounds = array<i64: 128, 128>}]} {
    %c0 = arith.constant 0 : index
    %c0_0 = arith.constant 0 : index
    %0 = vector.load %arg1[%c0, %c0_0] : memref<128x32xf32, #tpu.memory_space<vmem>>, vector<128x32xf32>
    %1 = arith.truncf %0 : vector<128x32xf32> to vector<128x32xbf16>
    %c0_1 = arith.constant 0 : index
    %c0_2 = arith.constant 0 : index
    %2 = vector.load %arg2[%c0_1, %c0_2] : memref<32x256xbf16, #tpu.memory_space<vmem>>, vector<32x256xbf16>
    %cst = arith.constant dense<0.000000e+00> : vector<128x256xf32>
    %3 = tpu.matmul %1, %2, %cst {dimension_numbers = #tpu.dot_dimension_numbers<[1], [0], [0], [1], [0, 0, 1, 1], [], []>} : vector<128x32xbf16>, vector<32x256xbf16>, vector<128x256xf32> -> vector<128x256xf32>
    %c0_3 = arith.constant 0 : index
    %c0_4 = arith.constant 0 : index
    %4 = vector.load %arg3[%c0_3, %c0_4] : memref<1x256xf32, #tpu.memory_space<vmem>>, vector<1x256xf32>
    %5 = vector.broadcast %4 : vector<1x256xf32> to vector<128x256xf32>
    %6 = arith.addf %3, %5 : vector<128x256xf32>
    %cst_5 = arith.constant 0.000000e+00 : f32
    %7 = vector.broadcast %cst_5 : f32 to vector<128x256xf32>
    %8 = arith.maximumf %6, %7 : vector<128x256xf32>
    %9 = arith.truncf %8 : vector<128x256xf32> to vector<128x256xbf16>
    %c0_6 = arith.constant 0 : index
    %c0_7 = arith.constant 0 : index
    %10 = vector.load %arg4[%c0_6, %c0_7] : memref<256x256xbf16, #tpu.memory_space<vmem>>, vector<256x256xbf16>
    %cst_8 = arith.constant dense<0.000000e+00> : vector<128x256xf32>
    %11 = tpu.matmul %9, %10, %cst_8 {dimension_numbers = #tpu.dot_dimension_numbers<[1], [0], [0], [1], [0, 0, 1, 1], [], []>} : vector<128x256xbf16>, vector<256x256xbf16>, vector<128x256xf32> -> vector<128x256xf32>
    %c0_9 = arith.constant 0 : index
    %c0_10 = arith.constant 0 : index
    %12 = vector.load %arg5[%c0_9, %c0_10] : memref<1x256xf32, #tpu.memory_space<vmem>>, vector<1x256xf32>
    %13 = vector.broadcast %12 : vector<1x256xf32> to vector<128x256xf32>
    %14 = arith.addf %11, %13 : vector<128x256xf32>
    %cst_11 = arith.constant 0.000000e+00 : f32
    %15 = vector.broadcast %cst_11 : f32 to vector<128x256xf32>
    %16 = arith.maximumf %14, %15 : vector<128x256xf32>
    %17 = arith.truncf %16 : vector<128x256xf32> to vector<128x256xbf16>
    %c0_12 = arith.constant 0 : index
    %c0_13 = arith.constant 0 : index
    %18 = vector.load %arg6[%c0_12, %c0_13] : memref<256x128xbf16, #tpu.memory_space<vmem>>, vector<256x128xbf16>
    %cst_14 = arith.constant dense<0.000000e+00> : vector<128x128xf32>
    %19 = tpu.matmul %17, %18, %cst_14 {dimension_numbers = #tpu.dot_dimension_numbers<[1], [0], [0], [1], [0, 0, 1, 1], [], []>} : vector<128x256xbf16>, vector<256x128xbf16>, vector<128x128xf32> -> vector<128x128xf32>
    %c0_15 = arith.constant 0 : index
    %c0_16 = arith.constant 0 : index
    %20 = vector.load %arg7[%c0_15, %c0_16] : memref<1x128xf32, #tpu.memory_space<vmem>>, vector<1x128xf32>
    %21 = vector.broadcast %20 : vector<1x128xf32> to vector<128x128xf32>
    %22 = arith.addf %19, %21 : vector<128x128xf32>
    %c0_17 = arith.constant 0 : index
    %c0_18 = arith.constant 0 : index
    %23 = vector.load %arg8[%c0_17, %c0_18] : memref<128x128xf32, #tpu.memory_space<vmem>>, vector<128x128xf32>
    tpu.vector_store %arg8[%c0_17, %c0_18], %22 {strides = array<i32>} : memref<128x128xf32, #tpu.memory_space<vmem>>, vector<128x128xf32>,
    return
  }
  func.func @transform_0(%arg0: i32) -> (i32, i32) {
    %c0_i32 = arith.constant 0 : i32
    %c0_i32_0 = arith.constant 0 : i32
    return %arg0, %c0_i32 : i32, i32
  }
  func.func @transform_1(%arg0: i32) -> (i32, i32) {
    %c0_i32 = arith.constant 0 : i32
    %c0_i32_0 = arith.constant 0 : i32
    %c0_i32_1 = arith.constant 0 : i32
    return %c0_i32, %c0_i32_0 : i32, i32
  }
  func.func @transform_2(%arg0: i32) -> (i32, i32) {
    %c0_i32 = arith.constant 0 : i32
    %c0_i32_0 = arith.constant 0 : i32
    %c0_i32_1 = arith.constant 0 : i32
    return %c0_i32, %c0_i32_0 : i32, i32
  }
  func.func @transform_3(%arg0: i32) -> (i32, i32) {
    %c0_i32 = arith.constant 0 : i32
    %c0_i32_0 = arith.constant 0 : i32
    %c0_i32_1 = arith.constant 0 : i32
    return %c0_i32, %c0_i32_0 : i32, i32
  }
  func.func @transform_4(%arg0: i32) -> (i32, i32) {
    %c0_i32 = arith.constant 0 : i32
    %c0_i32_0 = arith.constant 0 : i32
    %c0_i32_1 = arith.constant 0 : i32
    return %c0_i32, %c0_i32_0 : i32, i32
  }
  func.func @transform_5(%arg0: i32) -> (i32, i32) {
    %c0_i32 = arith.constant 0 : i32
    %c0_i32_0 = arith.constant 0 : i32
    %c0_i32_1 = arith.constant 0 : i32
    return %c0_i32, %c0_i32_0 : i32, i32
  }
  func.func @transform_6(%arg0: i32) -> (i32, i32) {
    %c0_i32 = arith.constant 0 : i32
    %c0_i32_0 = arith.constant 0 : i32
    %c0_i32_1 = arith.constant 0 : i32
    return %c0_i32, %c0_i32_0 : i32, i32
  }
  func.func @transform_7(%arg0: i32) -> (i32, i32) {
    %c0_i32 = arith.constant 0 : i32
    %c0_i32_0 = arith.constant 0 : i32
    return %arg0, %c0_i32 : i32, i32
  }
}

</mosaic_0001>

<bundles_post_ra>
// kernel: critic_forward.1
= control target key start
LH: loop header
LB: loop body
LE: loop exit
PB: predicated region body
PF: predicated region fallthrough
CT: control target
= control target key end

     0   :  { %s1462_s24 = smov 0   ;;  %s1805_s0 = inlined_call_operand.vmem [shape: f32[256,32], index: 0, kind: input, shape index: {}]   ;;  %s1806_s1 = inlined_call_operand.vmem [shape: bf16[32,256], index: 1, kind: input, shape index: {}]   ;;  %s1807_s2 = inlined_call_operand.vmem [shape: f32[1,256], index: 2, kind: input, shape index: {}]   ;;  %s1808_s3 = inlined_call_operand.vmem [shape: bf16[256,256], index: 3, kind: input, shape index: {}]   ;;  %s1809_s4 = inlined_call_operand.vmem [shape: f32[1,256], index: 4, kind: input, shape index: {}]   ;;  %s1810_s5 = inlined_call_operand.vmem [shape: bf16[256,128], index: 5, kind: input, shape index: {}]   ;;  %s1811_s6 = inlined_call_operand.vmem [shape: f32[1,128], index: 6, kind: input, shape index: {}]   ;;  %s1812_s7 = inlined_call_operand.vmem [shape: f32[256,128], index: 7, kind: output, shape index: {}]  }
   0x1 LB: > { %s1198_s25 = sadd.s32 4294967295, %s1419_s24   ;;  %p1202_p0 = scmp.ge.s32.totalorder %s1419_s24, 1  ;;  %s1419_s24 = sphi %s1462_s24, %s17_s24  }
   0x2   : > { %p238_p1 = scmp.lt.s32.totalorder %s1419_s24, 3 }
   0x4   : > { %p239_p2 = pnand %p1202_p0, %p238_p1 }
   0x5   : > { %s1203_s28 = sshll.u32 (!%p239_p2), %s1198_s25, 4 }
   0x6   : > { %242 = sbr.rel (%p239_p2) target bundleno = 692 (0x2b4), region = 48  ;;  %p271_p3 = scmp.lt.s32.totalorder (!%p239_p2), %s1203_s28, 31 }
   0xb   : > { %v1343_v0 = vld [vmem:[%s1806_s1 + $0x14] ss:$8 sps:$4 sm:$0xff]   ;;  %v1345_v1 = vld [vmem:[%s1806_s1 + $0x10] ss:$8 sps:$4 sm:$0xff]   ;;  %v1421_v2 = vmov 0   ;;  %s1814_s28 = smov (!%p271_p3, %s1203_s28), 31 }
   0xc   : > { %400 = vmatprep.mubr.bf16.mxu0 %v1421_v2  ;;  %380 = vmatprep.subr.bf16.mxu0 %v1343_v0  ;;  %v1346_v3 = vld [vmem:[%s1806_s1 + $0x4] ss:$8 sps:$4 sm:$0xff]   ;;  %v1348_v4 = vld [vmem:[%s1806_s1] ss:$8 sps:$4 sm:$0xff]   ;;  %v1349_v5 = vld [vmem:[%s1808_s3 + $0x74] ss:$8 sps:$4 sm:$0xff]  }
   0xd   : > { %381 = vmatpush1.bf16.msra.mxu0 %v1345_v1  ;;  %v1351_v6 = vld [vmem:[%s1808_s3 + $0x70] ss:$8 sps:$4 sm:$0xff]   ;;  %v1352_v7 = vld [vmem:[%s1808_s3 + $0x64] ss:$8 sps:$4 sm:$0xff]   ;;  %s1204_s18 = sshll.u32 %s1814_s28, 3  ;;  %733 = vmatprep.subr.bf16.mxu1 %v1349_v5  ;;  %vm343_vm0 = vcmask 261120  }
   0xe   : > { %382 = vmatprep.subr.bf16.mxu0 %v1346_v3  ;;  %s1500_s21 = scalar_lea.vmem %s1805_s0, %s1204_s18  ;;  %734 = vmatpush1.bf16.msra.mxu1 %v1351_v6  ;;  %v1354_v8 = vld [vmem:[%s1808_s3 + $0x60] ss:$8 sps:$4 sm:$0xff]   ;;  %v1355_v11 = vld [vmem:[%s1808_s3 + $0x54] ss:$8 sps:$4 sm:$0xff]   ;;  %v1357_v13 = vld [vmem:[%s1808_s3 + $0x50] ss:$8 sps:$4 sm:$0xff]   ;;  %s1768_s22 = scalar_lea.vmem %s1812_s7, %s1204_s18 }
   0xf   : > { %v283_v9 = vld [vmem:[%s1500_s21] sm:$0xff]  ;;  %v284_v10 = vld [vmem:[%s1500_s21 + $0x8] sm:$0xff]  ;;  %735 = vmatprep.subr.bf16.mxu1 %v1352_v7  ;;  %v285_v14 = vld [vmem:[%s1500_s21 + $0x10] sm:$0xff] }
  0x10   : > { %v299_v12 = vpack.c.bf16 %v284_v10, %v283_v9  ;;  %v286_v15 = vld [vmem:[%s1500_s21 + $0x18] sm:$0xff]  ;;  %v1358_v16 = vld [vmem:[%s1808_s3 + $0x44] ss:$8 sps:$4 sm:$0xff]   ;;  %v1360_v18 = vld [vmem:[%s1808_s3 + $0x40] ss:$8 sps:$4 sm:$0xff]  }
  0x11   : > { %383 = vmatpush1.bf16.msra.mxu0 %v1348_v4  ;;  %v300_v17 = vpack.c.bf16 %v286_v15, %v285_v14  ;;  %v1361_v19 = vld [vmem:[%s1808_s3 + $0x34] ss:$8 sps:$4 sm:$0xff]   ;;  %v287_v20 = vld [vmem:[%s1500_s21 + $0x20] sm:$0xff]  ;;  %v1363_v21 = vld [vmem:[%s1808_s3 + $0x30] ss:$8 sps:$4 sm:$0xff]  }
  0x12   : > { %736 = vmatpush1.bf16.msra.mxu1 %v1354_v8  ;;  %v288_v22 = vld [vmem:[%s1500_s21 + $0x28] sm:$0xff]  ;;  %v1367_v26 = vld [vmem:[%s1808_s3 + $0x14] ss:$8 sps:$4 sm:$0xff]   ;;  %v1369_v29 = vld [vmem:[%s1808_s3 + $0x10] ss:$8 sps:$4 sm:$0xff]  }
  0x13   : > { %737 = vmatprep.subr.bf16.mxu1 %v1355_v11  ;;  %v1364_v23 = vld [vmem:[%s1808_s3 + $0x24] ss:$8 sps:$4 sm:$0xff]   ;;  %v301_v24 = vpack.c.bf16 %v288_v22, %v287_v20  ;;  %v1366_v25 = vld [vmem:[%s1808_s3 + $0x20] ss:$8 sps:$4 sm:$0xff]   ;;  %v289_v27 = vld [vmem:[%s1500_s21 + $0x30] sm:$0xff]  ;;  %v313_v11 = vlaneseq }
  0x14   : > { %1211 = vmatmul.mubr.msk.bf16.vlgmr.msra.gmra.mxu0 %vm343_vm0, %v299_v12  ;;  %v290_v28 = vld [vmem:[%s1500_s21 + $0x38] sm:$0xff]  ;;  %v1370_v30 = vld [vmem:[%s1808_s3 + $0x4] ss:$8 sps:$4 sm:$0xff]   ;;  %v1372_v31 = vld [vmem:[%s1808_s3] ss:$8 sps:$4 sm:$0xff]  }
  0x15   : > { %410 = vmatprep.mubr.bf16.mxu0 %v1421_v2  ;;  %v1373_v32 = vld [vmem:[%s1808_s3 + $0xf4] ss:$8 sps:$4 sm:$0xff]   ;;  %v302_v33 = vpack.c.bf16 %v290_v28, %v289_v27  ;;  %v1375_v34 = vld [vmem:[%s1808_s3 + $0xf0] ss:$8 sps:$4 sm:$0xff]   ;;  %v291_v35 = vld [vmem:[%s1500_s21 + $0x40] sm:$0xff]  ;;  %v1662_v12 = vshrl.u32 %v313_v11, 7 }
  0x16   : > { %738 = vmatpush1.bf16.msra.mxu1 %v1357_v13  ;;  %v292_v36 = vld [vmem:[%s1500_s21 + $0x48] sm:$0xff]  ;;  %v1379_v40 = vld [vmem:[%s1808_s3 + $0xd4] ss:$8 sps:$4 sm:$0xff]   ;;  %v1381_v41 = vld [vmem:[%s1808_s3 + $0xd0] ss:$8 sps:$4 sm:$0xff]  }
  0x17   : > { %739 = vmatprep.subr.bf16.mxu1 %v1358_v16  ;;  %v1376_v37 = vld [vmem:[%s1808_s3 + $0xe4] ss:$8 sps:$4 sm:$0xff]   ;;  %v303_v38 = vpack.c.bf16 %v292_v36, %v291_v35  ;;  %v1378_v39 = vld [vmem:[%s1808_s3 + $0xe0] ss:$8 sps:$4 sm:$0xff]   ;;  %v293_v42 = vld [vmem:[%s1500_s21 + $0x50] sm:$0xff]  ;;  %v319_v13 = vsub.s32 1, %v1662_v12 }
  0x18   : > { %v294_v43 = vld [vmem:[%s1500_s21 + $0x58] sm:$0xff]  ;;  %v1382_v44 = vld [vmem:[%s1808_s3 + $0xc4] ss:$8 sps:$4 sm:$0xff]   ;;  %v1384_v46 = vld [vmem:[%s1808_s3 + $0xc0] ss:$8 sps:$4 sm:$0xff]   ;;  %v315_v14 = vsub.s32 0, %v1662_v12 }
  0x19   : > { %v304_v45 = vpack.c.bf16 %v294_v43, %v293_v42  ;;  %v1385_v47 = vld [vmem:[%s1808_s3 + $0xb4] ss:$8 sps:$4 sm:$0xff]   ;;  %v1387_v48 = vld [vmem:[%s1808_s3 + $0xb0] ss:$8 sps:$4 sm:$0xff]   ;;  %v295_v49 = vld [vmem:[%s1500_s21 + $0x60] sm:$0xff] }
  0x1a   : > { %740 = vmatpush1.bf16.msra.mxu1 %v1360_v18  ;;  %v296_v50 = vld [vmem:[%s1500_s21 + $0x68] sm:$0xff]  ;;  %v297_v52 = vld [vmem:[%s1500_s21 + $0x70] sm:$0xff]  ;;  %v298_v53 = vld [vmem:[%s1500_s21 + $0x78] sm:$0xff] }
  0x1b   : > { %741 = vmatprep.subr.bf16.mxu1 %v1361_v19  ;;  %v305_v51 = vpack.c.bf16 %v296_v50, %v295_v49  ;;  %v306_v54 = vpack.c.bf16 %v298_v53, %v297_v52  ;;  %v1388_v55 = vld [vmem:[%s1808_s3 + $0xa4] ss:$8 sps:$4 sm:$0xff]   ;;  %v1390_v56 = vld [vmem:[%s1808_s3 + $0xa0] ss:$8 sps:$4 sm:$0xff]   ;;  %v1391_v57 = vld [vmem:[%s1808_s3 + $0x94] ss:$8 sps:$4 sm:$0xff]  }
  0x1c   : > { %1212 = vmatmul.mubr.msk.bf16.gmra.mxu0 %vm343_vm0, %v300_v17  ;;  %v1393_v58 = vld [vmem:[%s1808_s3 + $0x90] ss:$8 sps:$4 sm:$0xff]   ;;  %v1394_v59 = vld [vmem:[%s1808_s3 + $0x84] ss:$8 sps:$4 sm:$0xff]   ;;  %v1396_v60 = vld [vmem:[%s1808_s3 + $0x80] ss:$8 sps:$4 sm:$0xff]  }
  0x1d   : > { %420 = vmatprep.mubr.bf16.mxu0 %v1421_v2  ;;  %v1397_v61 = vld [vmem:[%s1810_s5 + $0x78] sm:$0xff]   ;;  %v1399_v63 = vld [vmem:[%s1810_s5 + $0x70] sm:$0xff]   ;;  %v1401_v1 = vld [vmem:[%s1810_s5 + $0x68] sm:$0xff]  }
  0x1e   : > { %742 = vmatpush1.bf16.msra.mxu1 %v1363_v21  ;;  %v1398_v62 = vld [vmem:[%s1810_s5 + $0x38] sm:$0xff]   ;;  %1270 = vmatprep.subr.bf16.mxu0 %v1397_v61  ;;  %v1400_v0 = vld [vmem:[%s1810_s5 + $0x30] sm:$0xff]   ;;  %v1403_v3 = vld [vmem:[%s1810_s5 + $0x60] sm:$0xff]  }
  0x1f   : > { %743 = vmatprep.subr.bf16.mxu1 %v1364_v23  ;;  %1271 = vmatpush3.bf16.msra.mxu0 %v1398_v62  ;;  %v1404_v4 = vld [vmem:[%s1810_s5 + $0x20] sm:$0xff]   ;;  %v1405_v5 = vld [vmem:[%s1810_s5 + $0x58] sm:$0xff]   ;;  %v1407_v7 = vld [vmem:[%s1810_s5 + $0x50] sm:$0xff]  }
  0x20   : > { %1272 = vmatprep.subr.bf16.mxu0 %v1399_v63  ;;  %v1406_v6 = vld [vmem:[%s1810_s5 + $0x18] sm:$0xff]   ;;  %v1408_v8 = vld [vmem:[%s1810_s5 + $0x10] sm:$0xff]   ;;  %v1409_v9 = vld [vmem:[%s1810_s5 + $0x48] sm:$0xff]  }
  0x21   : > { %v1410_v10 = vld [vmem:[%s1810_s5 + $0x8] sm:$0xff]   ;;  %v311_v15 = vld [vmem:[%s1807_s2] sm:$0x3] }
  0x22   : > { %744 = vmatpush1.bf16.msra.mxu1 %v1366_v25  ;;  %v1671_v17 = vrot.slane %v311_v15, %v319_v13  ;;  %v1675_v18 = vrot.slane %v311_v15, %v315_v14 }
  0x23   : > { %745 = vmatprep.subr.bf16.mxu1 %v1367_v26  ;;  %1273 = vmatpush3.bf16.msra.mxu0 %v1400_v0 }
  0x24   : > { %1213 = vmatmul.mubr.msk.bf16.gmra.mxu0 %vm343_vm0, %v301_v24  ;;  %1274 = vmatprep.subr.bf16.mxu0 %v1401_v1 }
  0x25   : > { %430 = vmatprep.mubr.bf16.mxu0 %v1421_v2 }
  0x26   : > { %746 = vmatpush1.bf16.msra.mxu1 %v1369_v29 }
  0x27   : > { %747 = vmatprep.subr.bf16.mxu1 %v1370_v30 }
  0x2a   : > { %748 = vmatpush1.bf16.msra.mxu1 %v1372_v31 }
  0x2b   : > { %749 = vmatprep.subr.bf16.mxu1 %v1373_v32 }
  0x2c   : > { %1214 = vmatmul.mubr.msk.bf16.gmra.mxu0 %vm343_vm0, %v302_v33 }
  0x2d   : > { %440 = vmatprep.mubr.bf16.mxu0 %v1421_v2 }
  0x2e   : > { %750 = vmatpush2.bf16.msra.mxu1 %v1375_v34 }
  0x2f   : > { %751 = vmatprep.subr.bf16.mxu1 %v1376_v37 }
  0x32   : > { %752 = vmatpush2.bf16.msra.mxu1 %v1378_v39 }
  0x33   : > { %753 = vmatprep.subr.bf16.mxu1 %v1379_v40 }
  0x34   : > { %1215 = vmatmul.mubr.msk.bf16.gmra.mxu0 %vm343_vm0, %v303_v38 }
  0x35   : > { %450 = vmatprep.mubr.bf16.mxu0 %v1421_v2 }
  0x36   : > { %754 = vmatpush2.bf16.msra.mxu1 %v1381_v41 }
  0x37   : > { %755 = vmatprep.subr.bf16.mxu1 %v1382_v44 }
  0x3a   : > { %756 = vmatpush2.bf16.msra.mxu1 %v1384_v46 }
  0x3b   : > { %757 = vmatprep.subr.bf16.mxu1 %v1385_v47 }
  0x3c   : > { %1216 = vmatmul.mubr.msk.bf16.gmra.mxu0 %vm343_vm0, %v304_v45 }
  0x3d   : > { %460 = vmatprep.mubr.bf16.mxu0 %v1421_v2 }
  0x3e   : > { %758 = vmatpush2.bf16.msra.mxu1 %v1387_v48 }
  0x3f   : > { %759 = vmatprep.subr.bf16.mxu1 %v1388_v55 }
  0x42   : > { %760 = vmatpush2.bf16.msra.mxu1 %v1390_v56 }
  0x43   : > { %761 = vmatprep.subr.bf16.mxu1 %v1391_v57 }
  0x44   : > { %1217 = vmatmul.mubr.msk.bf16.gmra.mxu0 %vm343_vm0, %v305_v51 }
  0x45   : > { %470 = vmatprep.mubr.bf16.mxu0 %v1421_v2  ;;  %v1402_v2 = vld [vmem:[%s1810_s5 + $0x28] sm:$0xff]  }
  0x46   : > { %762 = vmatpush2.bf16.msra.mxu1 %v1393_v58  ;;  %1275 = vmatpush3.bf16.msra.mxu0 %v1402_v2 }
  0x47   : > { %763 = vmatprep.subr.bf16.mxu1 %v1394_v59  ;;  %1276 = vmatprep.subr.bf16.mxu0 %v1403_v3 }
  0x4a   : > { %764 = vmatpush2.bf16.msra.mxu1 %v1396_v60  ;;  %1277 = vmatpush3.bf16.msra.mxu0 %v1404_v4 }
  0x4b   : > { %1278 = vmatprep.subr.bf16.mxu0 %v1405_v5 }
  0x4c   : > { %1218 = vmatmul.mubr.msk.bf16.gmra.mxu0 %vm343_vm0, %v306_v54 }
  0x4e   : > { %1279 = vmatpush3.bf16.msra.mxu0 %v1406_v6 }
  0x4f   : > { %1280 = vmatprep.subr.bf16.mxu0 %v1407_v7 }
  0x52   : > { %1281 = vmatpush3.bf16.msra.mxu0 %v1408_v8 }
  0x53   : > { %1282 = vmatprep.subr.bf16.mxu0 %v1409_v9 }
  0x56   : > { %1283 = vmatpush3.bf16.msra.mxu0 %v1410_v10 }
  0xd4   : > { %v402_v16 = vpop.f32.mrf.mxu0 }
  0xd5   : > { %v403_v23 = vadd.f32 %v402_v16, %v1675_v18 }
  0xd6   : > { %v404_v19 = vpop.f32.mrf.mxu0 }
  0xd7   : > { %v405_v21 = vadd.f32 %v404_v19, %v1671_v17  ;;  %v481_v30 = vmax.f32 %v403_v23, 0.0 }
  0xd8   : > { %v406_v20 = vpop.f32.mrf.mxu0 }
  0xd9   : > { %v407_v22 = vadd.f32 %v406_v20, %v1675_v18  ;;  %v482_v28 = vmax.f32 %v405_v21, 0.0 }
  0xda   : > { %v408_v24 = vpop.f32.mrf.mxu0 }
  0xdb   : > { %v409_v25 = vadd.f32 %v408_v24, %v1671_v17  ;;  %v483_v26 = vmax.f32 %v407_v22, 0.0 }
  0xdc   : > { %v412_v27 = vpop.f32.mrf.mxu0 }
  0xdd   : > { %v484_v29 = vmax.f32 %v409_v25, 0.0  ;;  %v513_v33 = vpack.c.bf16 %v483_v26, %v481_v30  ;;  %v413_v37 = vadd.f32 %v412_v27, %v1675_v18 }
  0xde   : > { %v414_v31 = vpop.f32.mrf.mxu0 }
  0xdf   : > { %v514_v32 = vpack.c.bf16 %v484_v29, %v482_v28  ;;  %v415_v35 = vadd.f32 %v414_v31, %v1671_v17  ;;  %v485_v44 = vmax.f32 %v413_v37, 0.0 }
  0xe0   : > { %v416_v34 = vpop.f32.mrf.mxu0 }
  0xe1   : > { %v417_v36 = vadd.f32 %v416_v34, %v1675_v18  ;;  %765 = vmatprep.mubr.bf16.mxu1 %v514_v32  ;;  %v486_v42 = vmax.f32 %v415_v35, 0.0 }
  0xe2   : > { %v418_v38 = vpop.f32.mrf.mxu0  ;;  %766 = vmatmul.mubr.bf16.vlgmr.msra.gmra.mxu1 %v513_v33 }
  0xe3   : > { %v419_v39 = vadd.f32 %v418_v38, %v1671_v17  ;;  %v487_v40 = vmax.f32 %v417_v36, 0.0 }
  0xe4   : > { %v422_v41 = vpop.f32.mrf.mxu0 }
  0xe5   : > { %v488_v43 = vmax.f32 %v419_v39, 0.0  ;;  %v515_v47 = vpack.c.bf16 %v487_v40, %v485_v44  ;;  %v423_v51 = vadd.f32 %v422_v41, %v1675_v18 }
  0xe6   : > { %v424_v45 = vpop.f32.mrf.mxu0 }
  0xe7   : > { %v516_v46 = vpack.c.bf16 %v488_v43, %v486_v42  ;;  %v425_v49 = vadd.f32 %v424_v45, %v1671_v17  ;;  %v489_v58 = vmax.f32 %v423_v51, 0.0 }
  0xe8   : > { %v426_v48 = vpop.f32.mrf.mxu0 }
  0xe9   : > { %v427_v50 = vadd.f32 %v426_v48, %v1675_v18  ;;  %775 = vmatprep.mubr.bf16.mxu1 %v516_v46  ;;  %v490_v56 = vmax.f32 %v425_v49, 0.0 }
  0xea   : > { %v428_v52 = vpop.f32.mrf.mxu0  ;;  %776 = vmatmul.mubr.bf16.gmra.mxu1 %v515_v47 }
  0xeb   : > { %v429_v53 = vadd.f32 %v428_v52, %v1671_v17  ;;  %v491_v54 = vmax.f32 %v427_v50, 0.0 }
  0xec   : > { %v432_v55 = vpop.f32.mrf.mxu0 }
  0xed   : > { %v492_v57 = vmax.f32 %v429_v53, 0.0  ;;  %v517_v61 = vpack.c.bf16 %v491_v54, %v489_v58  ;;  %v433_v1 = vadd.f32 %v432_v55, %v1675_v18 }
  0xee   : > { %v434_v59 = vpop.f32.mrf.mxu0 }
  0xef   : > { %v518_v60 = vpack.c.bf16 %v492_v57, %v490_v56  ;;  %v435_v63 = vadd.f32 %v434_v59, %v1671_v17  ;;  %v493_v8 = vmax.f32 %v433_v1, 0.0 }
  0xf0   : > { %v436_v62 = vpop.f32.mrf.mxu0 }
  0xf1   : > { %v437_v0 = vadd.f32 %v436_v62, %v1675_v18  ;;  %785 = vmatprep.mubr.bf16.mxu1 %v518_v60  ;;  %v494_v6 = vmax.f32 %v435_v63, 0.0 }
  0xf2   : > { %v438_v2 = vpop.f32.mrf.mxu0  ;;  %786 = vmatmul.mubr.bf16.gmra.mxu1 %v517_v61 }
  0xf3   : > { %v439_v3 = vadd.f32 %v438_v2, %v1671_v17  ;;  %v495_v4 = vmax.f32 %v437_v0, 0.0 }
  0xf4   : > { %v442_v5 = vpop.f32.mrf.mxu0 }
  0xf5   : > { %v496_v7 = vmax.f32 %v439_v3, 0.0  ;;  %v519_v11 = vpack.c.bf16 %v495_v4, %v493_v8  ;;  %v443_v20 = vadd.f32 %v442_v5, %v1675_v18 }
  0xf6   : > { %v444_v9 = vpop.f32.mrf.mxu0 }
  0xf7   : > { %v520_v10 = vpack.c.bf16 %v496_v7, %v494_v6  ;;  %v445_v16 = vadd.f32 %v444_v9, %v1671_v17  ;;  %v497_v27 = vmax.f32 %v443_v20, 0.0  ;;  %v1411_v7 = vld [vmem:[%s1810_s5 + $0x40] sm:$0xff]  }
  0xf8   : > { %v446_v15 = vpop.f32.mrf.mxu0  ;;  %1284 = vmatprep.subr.bf16.mxu0 %v1411_v7 }
  0xf9   : > { %v447_v19 = vadd.f32 %v446_v15, %v1675_v18  ;;  %795 = vmatprep.mubr.bf16.mxu1 %v520_v10  ;;  %v498_v25 = vmax.f32 %v445_v16, 0.0 }
  0xfa   : > { %v448_v21 = vpop.f32.mrf.mxu0  ;;  %796 = vmatmul.mubr.bf16.gmra.mxu1 %v519_v11 }
  0xfb   : > { %v449_v22 = vadd.f32 %v448_v21, %v1671_v17  ;;  %v499_v23 = vmax.f32 %v447_v19, 0.0 }
  0xfc   : > { %v452_v24 = vpop.f32.mrf.mxu0 }
  0xfd   : > { %v500_v26 = vmax.f32 %v449_v22, 0.0  ;;  %v521_v30 = vpack.c.bf16 %v499_v23, %v497_v27  ;;  %v453_v34 = vadd.f32 %v452_v24, %v1675_v18 }
  0xfe   : > { %v454_v28 = vpop.f32.mrf.mxu0 }
  0xff   : > { %v522_v29 = vpack.c.bf16 %v500_v26, %v498_v25  ;;  %v455_v32 = vadd.f32 %v454_v28, %v1671_v17  ;;  %v501_v41 = vmax.f32 %v453_v34, 0.0 }
 0x100   : > { %v456_v31 = vpop.f32.mrf.mxu0 }
 0x101   : > { %v457_v33 = vadd.f32 %v456_v31, %v1675_v18  ;;  %805 = vmatprep.mubr.bf16.mxu1 %v522_v29  ;;  %v502_v39 = vmax.f32 %v455_v32, 0.0 }
 0x102   : > { %v458_v35 = vpop.f32.mrf.mxu0  ;;  %806 = vmatmul.mubr.bf16.gmra.mxu1 %v521_v30 }
 0x103   : > { %v459_v36 = vadd.f32 %v458_v35, %v1671_v17  ;;  %v503_v37 = vmax.f32 %v457_v33, 0.0 }
 0x104   : > { %v462_v38 = vpop.f32.mrf.mxu0 }
 0x105   : > { %v504_v40 = vmax.f32 %v459_v36, 0.0  ;;  %v523_v44 = vpack.c.bf16 %v503_v37, %v501_v41  ;;  %v463_v48 = vadd.f32 %v462_v38, %v1675_v18 }
 0x106   : > { %v464_v42 = vpop.f32.mrf.mxu0 }
 0x107   : > { %v524_v43 = vpack.c.bf16 %v504_v40, %v502_v39  ;;  %v465_v46 = vadd.f32 %v464_v42, %v1671_v17  ;;  %v505_v55 = vmax.f32 %v463_v48, 0.0 }
 0x108   : > { %v466_v45 = vpop.f32.mrf.mxu0 }
 0x109   : > { %v467_v47 = vadd.f32 %v466_v45, %v1675_v18  ;;  %815 = vmatprep.mubr.bf16.mxu1 %v524_v43  ;;  %v506_v53 = vmax.f32 %v465_v46, 0.0 }
 0x10a   : > { %v468_v49 = vpop.f32.mrf.mxu0  ;;  %816 = vmatmul.mubr.bf16.gmra.mxu1 %v523_v44 }
 0x10b   : > { %v469_v50 = vadd.f32 %v468_v49, %v1671_v17  ;;  %v507_v51 = vmax.f32 %v467_v47, 0.0 }
 0x10c   : > { %v472_v52 = vpop.f32.mrf.mxu0 }
 0x10d   : > { %v508_v54 = vmax.f32 %v469_v50, 0.0  ;;  %v525_v58 = vpack.c.bf16 %v507_v51, %v505_v55  ;;  %v473_v62 = vadd.f32 %v472_v52, %v1675_v18 }
 0x10e   : > { %v474_v56 = vpop.f32.mrf.mxu0 }
 0x10f   : > { %v526_v57 = vpack.c.bf16 %v508_v54, %v506_v53  ;;  %v475_v60 = vadd.f32 %v474_v56, %v1671_v17  ;;  %v509_v4 = vmax.f32 %v473_v62, 0.0 }
 0x110   : > { %v476_v59 = vpop.f32.mrf.mxu0 }
 0x111   : > { %v477_v61 = vadd.f32 %v476_v59, %v1675_v18  ;;  %825 = vmatprep.mubr.bf16.mxu1 %v526_v57  ;;  %v510_v2 = vmax.f32 %v475_v60, 0.0  ;;  %v1412_v18 = vld [vmem:[%s1810_s5] sm:$0xff]  }
 0x112   : > { %v478_v63 = vpop.f32.mrf.mxu0  ;;  %826 = vmatmul.mubr.bf16.gmra.mxu1 %v525_v58  ;;  %1285 = vmatpush3.bf16.msra.mxu0 %v1412_v18 }
 0x113   : > { %v479_v0 = vadd.f32 %v478_v63, %v1671_v17  ;;  %v511_v1 = vmax.f32 %v477_v61, 0.0  ;;  %v561_v17 = vld [vmem:[%s1809_s4] sm:$0x3] }
 0x114   : > { %v1720_v9 = vrot.slane %v561_v17, %v319_v13  ;;  %v1724_v10 = vrot.slane %v561_v17, %v315_v14 }
 0x115   : > { %v512_v3 = vmax.f32 %v479_v0, 0.0  ;;  %v527_v6 = vpack.c.bf16 %v511_v1, %v509_v4 }
 0x117   : > { %v528_v5 = vpack.c.bf16 %v512_v3, %v510_v2 }
 0x119   : > { %835 = vmatprep.mubr.bf16.mxu1 %v528_v5 }
 0x11a   : > { %836 = vmatmul.mubr.bf16.gmra.mxu1 %v527_v6 }
 0x1a2   : > { %v767_v8 = vpop.f32.mrf.mxu1 }
 0x1a3   : > { %v768_v20 = vadd.f32 %v767_v8, %v1724_v10 }
 0x1a4   : > { %v769_v11 = vpop.f32.mrf.mxu1 }
 0x1a5   : > { %v770_v16 = vadd.f32 %v769_v11, %v1720_v9  ;;  %v846_v26 = vmax.f32 %v768_v20, 0.0 }
 0x1a6   : > { %v771_v15 = vpop.f32.mrf.mxu1 }
 0x1a7   : > { %v772_v19 = vadd.f32 %v771_v15, %v1724_v10  ;;  %v847_v25 = vmax.f32 %v770_v16, 0.0 }
 0x1a8   : > { %v773_v21 = vpop.f32.mrf.mxu1 }
 0x1a9   : > { %v774_v22 = vadd.f32 %v773_v21, %v1720_v9  ;;  %v848_v23 = vmax.f32 %v772_v19, 0.0 }
 0x1aa   : > { %v777_v24 = vpop.f32.mrf.mxu1 }
 0x1ab   : > { %v849_v13 = vmax.f32 %v774_v22, 0.0  ;;  %v878_v14 = vpack.c.bf16 %v848_v23, %v846_v26  ;;  %v778_v31 = vadd.f32 %v777_v24, %v1724_v10 }
 0x1ac   : > { %v779_v27 = vpop.f32.mrf.mxu1 }
 0x1ad   : > { %v879_v12 = vpack.c.bf16 %v849_v13, %v847_v25  ;;  %v780_v29 = vadd.f32 %v779_v27, %v1720_v9  ;;  %v850_v38 = vmax.f32 %v778_v31, 0.0 }
 0x1ae   : > { %v781_v28 = vpop.f32.mrf.mxu1 }
 0x1af   : > { %v782_v30 = vadd.f32 %v781_v28, %v1724_v10  ;;  %1061 = vmatprep.mubr.bf16.mxu0 %v879_v12  ;;  %v851_v36 = vmax.f32 %v780_v29, 0.0 }
 0x1b0   : > { %v783_v32 = vpop.f32.mrf.mxu1  ;;  %1062 = vmatmul.mubr.bf16.vlgmr.msra.gmra.mxu0 %v878_v14 }
 0x1b1   : > { %v784_v33 = vadd.f32 %v783_v32, %v1720_v9  ;;  %v852_v34 = vmax.f32 %v782_v30, 0.0 }
 0x1b2   : > { %v787_v35 = vpop.f32.mrf.mxu1 }
 0x1b3   : > { %v853_v37 = vmax.f32 %v784_v33, 0.0  ;;  %v880_v41 = vpack.c.bf16 %v852_v34, %v850_v38  ;;  %v788_v45 = vadd.f32 %v787_v35, %v1724_v10 }
 0x1b4   : > { %v789_v39 = vpop.f32.mrf.mxu1 }
 0x1b5   : > { %v881_v40 = vpack.c.bf16 %v853_v37, %v851_v36  ;;  %v790_v43 = vadd.f32 %v789_v39, %v1720_v9  ;;  %v854_v52 = vmax.f32 %v788_v45, 0.0 }
 0x1b6   : > { %v791_v42 = vpop.f32.mrf.mxu1 }
 0x1b7   : > { %v792_v44 = vadd.f32 %v791_v42, %v1724_v10  ;;  %1069 = vmatprep.mubr.bf16.mxu0 %v881_v40  ;;  %v855_v50 = vmax.f32 %v790_v43, 0.0 }
 0x1b8   : > { %v793_v46 = vpop.f32.mrf.mxu1  ;;  %1070 = vmatmul.mubr.bf16.gmra.mxu0 %v880_v41 }
 0x1b9   : > { %v794_v47 = vadd.f32 %v793_v46, %v1720_v9  ;;  %v856_v48 = vmax.f32 %v792_v44, 0.0 }
 0x1ba   : > { %v797_v49 = vpop.f32.mrf.mxu1 }
 0x1bb   : > { %v857_v51 = vmax.f32 %v794_v47, 0.0  ;;  %v882_v55 = vpack.c.bf16 %v856_v48, %v854_v52  ;;  %v798_v59 = vadd.f32 %v797_v49, %v1724_v10 }
 0x1bc   : > { %v799_v53 = vpop.f32.mrf.mxu1 }
 0x1bd   : > { %v883_v54 = vpack.c.bf16 %v857_v51, %v855_v50  ;;  %v800_v57 = vadd.f32 %v799_v53, %v1720_v9  ;;  %v858_v2 = vmax.f32 %v798_v59, 0.0 }
 0x1be   : > { %v801_v56 = vpop.f32.mrf.mxu1 }
 0x1bf   : > { %v802_v58 = vadd.f32 %v801_v56, %v1724_v10  ;;  %1077 = vmatprep.mubr.bf16.mxu0 %v883_v54  ;;  %v859_v0 = vmax.f32 %v800_v57, 0.0 }
 0x1c0   : > { %v803_v60 = vpop.f32.mrf.mxu1  ;;  %1078 = vmatmul.mubr.bf16.gmra.mxu0 %v882_v55 }
 0x1c1   : > { %v804_v61 = vadd.f32 %v803_v60, %v1720_v9  ;;  %v860_v62 = vmax.f32 %v802_v58, 0.0 }
 0x1c2   : > { %v807_v63 = vpop.f32.mrf.mxu1 }
 0x1c3   : > { %v861_v1 = vmax.f32 %v804_v61, 0.0  ;;  %v884_v5 = vpack.c.bf16 %v860_v62, %v858_v2  ;;  %v808_v17 = vadd.f32 %v807_v63, %v1724_v10  ;;  %v1761_v63 = vld [vmem:[%s1811_s6] ss:$0 sm:$0xff] }
 0x1c4   : > { %v809_v3 = vpop.f32.mrf.mxu1 }
 0x1c5   : > { %v885_v4 = vpack.c.bf16 %v861_v1, %v859_v0  ;;  %v810_v7 = vadd.f32 %v809_v3, %v1720_v9  ;;  %v862_v21 = vmax.f32 %v808_v17, 0.0 }
 0x1c6   : > { %v811_v6 = vpop.f32.mrf.mxu1 }
 0x1c7   : > { %v812_v18 = vadd.f32 %v811_v6, %v1724_v10  ;;  %1085 = vmatprep.mubr.bf16.mxu0 %v885_v4  ;;  %v863_v19 = vmax.f32 %v810_v7, 0.0 }
 0x1c8   : > { %v813_v8 = vpop.f32.mrf.mxu1  ;;  %1086 = vmatmul.mubr.bf16.gmra.mxu0 %v884_v5 }
 0x1c9   : > { %v814_v11 = vadd.f32 %v813_v8, %v1720_v9  ;;  %v864_v15 = vmax.f32 %v812_v18, 0.0 }
 0x1ca   : > { %v817_v16 = vpop.f32.mrf.mxu1 }
 0x1cb   : > { %v865_v20 = vmax.f32 %v814_v11, 0.0  ;;  %v886_v24 = vpack.c.bf16 %v864_v15, %v862_v21  ;;  %v818_v27 = vadd.f32 %v817_v16, %v1724_v10 }
 0x1cc   : > { %v819_v22 = vpop.f32.mrf.mxu1 }
 0x1cd   : > { %v887_v23 = vpack.c.bf16 %v865_v20, %v863_v19  ;;  %v820_v13 = vadd.f32 %v819_v22, %v1720_v9  ;;  %v866_v32 = vmax.f32 %v818_v27, 0.0 }
 0x1ce   : > { %v821_v25 = vpop.f32.mrf.mxu1 }
 0x1cf   : > { %v822_v26 = vadd.f32 %v821_v25, %v1724_v10  ;;  %1093 = vmatprep.mubr.bf16.mxu0 %v887_v23  ;;  %v867_v30 = vmax.f32 %v820_v13, 0.0 }
 0x1d0   : > { %v823_v12 = vpop.f32.mrf.mxu1  ;;  %1094 = vmatmul.mubr.bf16.gmra.mxu0 %v886_v24 }
 0x1d1   : > { %v824_v14 = vadd.f32 %v823_v12, %v1720_v9  ;;  %v868_v28 = vmax.f32 %v822_v26, 0.0 }
 0x1d2   : > { %v827_v29 = vpop.f32.mrf.mxu1 }
 0x1d3   : > { %v869_v31 = vmax.f32 %v824_v14, 0.0  ;;  %v888_v35 = vpack.c.bf16 %v868_v28, %v866_v32  ;;  %v828_v39 = vadd.f32 %v827_v29, %v1724_v10 }
 0x1d4   : > { %v829_v33 = vpop.f32.mrf.mxu1 }
 0x1d5   : > { %v889_v34 = vpack.c.bf16 %v869_v31, %v867_v30  ;;  %v830_v37 = vadd.f32 %v829_v33, %v1720_v9  ;;  %v870_v46 = vmax.f32 %v828_v39, 0.0 }
 0x1d6   : > { %v831_v36 = vpop.f32.mrf.mxu1 }
 0x1d7   : > { %v832_v38 = vadd.f32 %v831_v36, %v1724_v10  ;;  %1101 = vmatprep.mubr.bf16.mxu0 %v889_v34  ;;  %v871_v44 = vmax.f32 %v830_v37, 0.0 }
 0x1d8   : > { %v833_v40 = vpop.f32.mrf.mxu1  ;;  %1102 = vmatmul.mubr.bf16.gmra.mxu0 %v888_v35 }
 0x1d9   : > { %v834_v41 = vadd.f32 %v833_v40, %v1720_v9  ;;  %v872_v42 = vmax.f32 %v832_v38, 0.0 }
 0x1da   : > { %v837_v43 = vpop.f32.mrf.mxu1 }
 0x1db   : > { %v873_v45 = vmax.f32 %v834_v41, 0.0  ;;  %v890_v49 = vpack.c.bf16 %v872_v42, %v870_v46  ;;  %v838_v53 = vadd.f32 %v837_v43, %v1724_v10 }
 0x1dc   : > { %v839_v47 = vpop.f32.mrf.mxu1 }
 0x1dd   : > { %v891_v48 = vpack.c.bf16 %v873_v45, %v871_v44  ;;  %v840_v51 = vadd.f32 %v839_v47, %v1720_v9  ;;  %v874_v59 = vmax.f32 %v838_v53, 0.0 }
 0x1de   : > { %v841_v50 = vpop.f32.mrf.mxu1 }
 0x1df   : > { %v842_v52 = vadd.f32 %v841_v50, %v1724_v10  ;;  %1109 = vmatprep.mubr.bf16.mxu0 %v891_v48  ;;  %v875_v57 = vmax.f32 %v840_v51, 0.0 }
 0x1e0   : > { %v843_v54 = vpop.f32.mrf.mxu1  ;;  %1110 = vmatmul.mubr.bf16.gmra.mxu0 %v890_v49 }
 0x1e1   : > { %v844_v55 = vadd.f32 %v843_v54, %v1720_v9  ;;  %v876_v56 = vmax.f32 %v842_v52, 0.0 }
 0x1e3   : > { %v877_v58 = vmax.f32 %v844_v55, 0.0  ;;  %v892_v61 = vpack.c.bf16 %v876_v56, %v874_v59 }
 0x1e5   : > { %v893_v60 = vpack.c.bf16 %v877_v58, %v875_v57 }
 0x1e7   : > { %1117 = vmatprep.mubr.bf16.mxu0 %v893_v60 }
 0x1e8   : > { %1118 = vmatmul.mubr.bf16.gmra.mxu0 %v892_v61 }
 0x270   : > { %v1286_v62 = vpop.f32.mrf.mxu0 }
 0x272   : > { %v1287_v10 = vpop.f32.mrf.mxu0 }
 0x273   : > { %v1288_v0 = vadd.f32 %v1287_v10, %v1286_v62 }
 0x274   : > { %v1289_v9 = vpop.f32.mrf.mxu0 }
 0x275   : > { %v1064_v1 = vadd.f32 %v1288_v0, %v1761_v63 }
 0x276   : > { %v1290_v2 = vpop.f32.mrf.mxu0 }
 0x277   : > { %1126 = vst [vmem:[%s1768_s22] sm:$0xff] %v1064_v1  ;;  %v1291_v3 = vadd.f32 %v1290_v2, %v1289_v9 }
 0x278   : > { %v1292_v4 = vpop.f32.mrf.mxu0 }
 0x279   : > { %v1067_v5 = vadd.f32 %v1291_v3, %v1761_v63 }
 0x27a   : > { %v1293_v6 = vpop.f32.mrf.mxu0 }
 0x27b   : > { %1127 = vst [vmem:[%s1768_s22 + $0x8] sm:$0xff] %v1067_v5  ;;  %v1294_v7 = vadd.f32 %v1293_v6, %v1292_v4 }
 0x27c   : > { %v1295_v18 = vpop.f32.mrf.mxu0 }
 0x27d   : > { %v1072_v17 = vadd.f32 %v1294_v7, %v1761_v63 }
 0x27e   : > { %v1296_v8 = vpop.f32.mrf.mxu0 }
 0x27f   : > { %1128 = vst [vmem:[%s1768_s22 + $0x10] sm:$0xff] %v1072_v17  ;;  %v1297_v11 = vadd.f32 %v1296_v8, %v1295_v18 }
 0x280   : > { %v1298_v15 = vpop.f32.mrf.mxu0 }
 0x281   : > { %v1075_v16 = vadd.f32 %v1297_v11, %v1761_v63 }
 0x282   : > { %v1299_v19 = vpop.f32.mrf.mxu0 }
 0x283   : > { %1129 = vst [vmem:[%s1768_s22 + $0x18] sm:$0xff] %v1075_v16  ;;  %v1300_v20 = vadd.f32 %v1299_v19, %v1298_v15 }
 0x284   : > { %v1301_v21 = vpop.f32.mrf.mxu0 }
 0x285   : > { %v1080_v22 = vadd.f32 %v1300_v20, %v1761_v63 }
 0x286   : > { %v1302_v23 = vpop.f32.mrf.mxu0 }
 0x287   : > { %1130 = vst [vmem:[%s1768_s22 + $0x20] sm:$0xff] %v1080_v22  ;;  %v1303_v24 = vadd.f32 %v1302_v23, %v1301_v21 }
 0x288   : > { %v1304_v25 = vpop.f32.mrf.mxu0 }
 0x289   : > { %v1083_v13 = vadd.f32 %v1303_v24, %v1761_v63 }
 0x28a   : > { %v1305_v26 = vpop.f32.mrf.mxu0 }
 0x28b   : > { %1131 = vst [vmem:[%s1768_s22 + $0x28] sm:$0xff] %v1083_v13  ;;  %v1306_v27 = vadd.f32 %v1305_v26, %v1304_v25 }
 0x28c   : > { %v1307_v12 = vpop.f32.mrf.mxu0 }
 0x28d   : > { %v1088_v14 = vadd.f32 %v1306_v27, %v1761_v63 }
 0x28e   : > { %v1308_v28 = vpop.f32.mrf.mxu0 }
 0x28f   : > { %1132 = vst [vmem:[%s1768_s22 + $0x30] sm:$0xff] %v1088_v14  ;;  %v1309_v29 = vadd.f32 %v1308_v28, %v1307_v12 }
 0x290   : > { %v1310_v30 = vpop.f32.mrf.mxu0 }
 0x291   : > { %v1091_v31 = vadd.f32 %v1309_v29, %v1761_v63 }
 0x292   : > { %v1311_v32 = vpop.f32.mrf.mxu0 }
 0x293   : > { %1133 = vst [vmem:[%s1768_s22 + $0x38] sm:$0xff] %v1091_v31  ;;  %v1312_v33 = vadd.f32 %v1311_v32, %v1310_v30 }
 0x294   : > { %v1313_v34 = vpop.f32.mrf.mxu0 }
 0x295   : > { %v1096_v35 = vadd.f32 %v1312_v33, %v1761_v63 }
 0x296   : > { %v1314_v36 = vpop.f32.mrf.mxu0 }
 0x297   : > { %1134 = vst [vmem:[%s1768_s22 + $0x40] sm:$0xff] %v1096_v35  ;;  %v1315_v37 = vadd.f32 %v1314_v36, %v1313_v34 }
 0x298   : > { %v1316_v38 = vpop.f32.mrf.mxu0 }
 0x299   : > { %v1099_v39 = vadd.f32 %v1315_v37, %v1761_v63 }
 0x29a   : > { %v1317_v40 = vpop.f32.mrf.mxu0 }
 0x29b   : > { %1135 = vst [vmem:[%s1768_s22 + $0x48] sm:$0xff] %v1099_v39  ;;  %v1318_v41 = vadd.f32 %v1317_v40, %v1316_v38 }
 0x29c   : > { %v1319_v42 = vpop.f32.mrf.mxu0 }
 0x29d   : > { %v1104_v43 = vadd.f32 %v1318_v41, %v1761_v63 }
 0x29e   : > { %v1320_v44 = vpop.f32.mrf.mxu0 }
 0x29f   : > { %1136 = vst [vmem:[%s1768_s22 + $0x50] sm:$0xff] %v1104_v43  ;;  %v1321_v45 = vadd.f32 %v1320_v44, %v1319_v42 }
 0x2a0   : > { %v1322_v46 = vpop.f32.mrf.mxu0 }
 0x2a1   : > { %v1107_v47 = vadd.f32 %v1321_v45, %v1761_v63 }
 0x2a2   : > { %v1323_v48 = vpop.f32.mrf.mxu0 }
 0x2a3   : > { %1137 = vst [vmem:[%s1768_s22 + $0x58] sm:$0xff] %v1107_v47  ;;  %v1324_v49 = vadd.f32 %v1323_v48, %v1322_v46 }
 0x2a4   : > { %v1325_v50 = vpop.f32.mrf.mxu0 }
 0x2a5   : > { %v1112_v51 = vadd.f32 %v1324_v49, %v1761_v63 }
 0x2a6   : > { %v1326_v52 = vpop.f32.mrf.mxu0 }
 0x2a7   : > { %1138 = vst [vmem:[%s1768_s22 + $0x60] sm:$0xff] %v1112_v51  ;;  %v1327_v53 = vadd.f32 %v1326_v52, %v1325_v50 }
 0x2a8   : > { %v1328_v54 = vpop.f32.mrf.mxu0 }
 0x2a9   : > { %v1115_v55 = vadd.f32 %v1327_v53, %v1761_v63 }
 0x2aa   : > { %v1329_v56 = vpop.f32.mrf.mxu0 }
 0x2ab   : > { %1139 = vst [vmem:[%s1768_s22 + $0x68] sm:$0xff] %v1115_v55  ;;  %v1330_v57 = vadd.f32 %v1329_v56, %v1328_v54 }
 0x2ac   : > { %v1331_v58 = vpop.f32.mrf.mxu0 }
 0x2ad   : > { %v1120_v59 = vadd.f32 %v1330_v57, %v1761_v63 }
 0x2ae   : > { %v1332_v60 = vpop.f32.mrf.mxu0 }
 0x2af   : > { %1140 = vst [vmem:[%s1768_s22 + $0x70] sm:$0xff] %v1120_v59  ;;  %v1333_v61 = vadd.f32 %v1332_v60, %v1331_v58 }
 0x2b1   : > { %v1123_v62 = vadd.f32 %v1333_v61, %v1761_v63 }
 0x2b3   : > { %1141 = vst [vmem:[%s1768_s22 + $0x78] sm:$0xff] %v1123_v62 }
 0x2b4 PF: > { %s17_s24 = sadd.s32 1, %s1419_s24  }
 0x2b5   : > { %p14_p4 = scmp.ge.s32.totalorder %s17_s24, 4  }
 0x2b7   :  { %16 = sbr.rel (!%p14_p4) target bundleno = 1 (0x1), region = 78 }

</bundles_post_ra>
